<compile_context>
chip_gen: v7x
topology: tpu7x:2x2x1
jax: 0.10.0
libtpu: 0.0.40
codegen_flags: <defaults>
</compile_context>

<pallas_src>
import functools
import math

import jax
import jax.numpy as jnp
from jax.experimental import pallas as pl
from jax.experimental.pallas import tpu as pltpu

LANES = 128
_MAX_TR = 4096     # 4096*128*4 B = 2 MiB / f32 input block; 2 inputs x 2 bufs = 8 MiB
_ROW_CHUNK = 512   # rows folded per inner accumulation step (256 KiB f32 temp)
_VMEM_LIMIT = 32 * 1024 * 1024   # fits v5e/v6e/v7x scoped VMEM with headroom


def _sublane_multiple(dtype) -> int:
    # f32 tile is (8,128); sub-32-bit dtypes pack along sublanes (bf16->16, i8->32).
    itemsize = jnp.dtype(dtype).itemsize
    return 8 * max(1, 4 // itemsize)


def _round_up(x: int, m: int) -> int:
    return ((x + m - 1) // m) * m


def _bce_partial_kernel(x_ref, y_ref, o_ref, *, tr, row_chunk, total_rows,
                        binary_labels):
    """One (tr,128) tile -> (8,128) partial sum of the *positive* log term.

    Accumulates  y*(log x - log(1-x)) + log(1-x)      (general / soft labels)
    or           clamp(log(where(y>=.5, x, 1-x)))     (binary_labels=True)
    The final negation and 1/N scale happen on the scalar in the wrapper.
    """
    i = pl.program_id(0)
    n_chunks = tr // row_chunk

    def chunk_partial(c, masked):
        r0 = pl.multiple_of(c * row_chunk, row_chunk)
        x = x_ref[pl.ds(r0, row_chunk), :].astype(jnp.float32)
        y = y_ref[pl.ds(r0, row_chunk), :].astype(jnp.float32)
        if binary_labels:
            # Hard {0,1} labels: one EUP log per element instead of two.
            sel = jnp.where(y >= 0.5, x, 1.0 - x)
            v = jnp.maximum(jnp.log(sel), -100.0)
        else:
            log_x = jnp.maximum(jnp.log(x), -100.0)          # torch BCELoss clamp
            log_1mx = jnp.maximum(jnp.log(1.0 - x), -100.0)
            v = y * (log_x - log_1mx) + log_1mx
        if masked:
            # Only the last (partial) block pays this; zero out-of-range rows
            # BEFORE any accumulation (OOB rows may hold garbage -> NaN logs).
            row_idx = (i * tr + r0
                       + jax.lax.broadcasted_iota(jnp.int32, (row_chunk, LANES), 0))
            v = jnp.where(row_idx < total_rows, v, 0.0)
        # Fold the leading (non-vreg) axis with VPU adds only.
        return v.reshape(row_chunk // 8, 8, LANES).sum(axis=0)

    def accumulate(masked):
        def body(c, acc):
            return acc + chunk_partial(c, masked)
        return jax.lax.fori_loop(0, n_chunks, body,
                                 jnp.zeros((8, LANES), jnp.float32),
                                 unroll=True)

    if total_rows % tr == 0:
        o_ref[...] = accumulate(masked=False)
    else:
        last = pl.num_programs(0) - 1

        @pl.when(i < last)      # fast path: full blocks, no per-element mask
        def _():
            o_ref[...] = accumulate(masked=False)

        @pl.when(i == last)     # only the final partial block is masked
        def _():
            o_ref[...] = accumulate(masked=True)


def _bce_pos_elementwise(x, y):
    """Un-negated clamped-log BCE term: y*log(x) + (1-y)*log(1-x)."""
    x = x.astype(jnp.float32)
    y = y.astype(jnp.float32)
    return (y * jnp.maximum(jnp.log(x), -100.0)
            + (1.0 - y) * jnp.maximum(jnp.log(1.0 - x), -100.0))


def contrastive_loss(output, label, *, binary_labels=False):
    """Forward of ContrastiveLoss (== nn.BCELoss, mean reduction). Any rank.

    binary_labels=True enables the single-log fast path (valid only for hard
    {0,1} labels); the default preserves torch's soft-label semantics.
    """
    assert output.shape == label.shape
    total = int(math.prod(output.shape)) if output.shape else 1

    x_flat = output.reshape(-1)
    y_flat = label.reshape(-1)

    main = (total // LANES) * LANES   # part handled by the kernel
    rem = total - main                # < 128 trailing elements (plain JAX)

    pos_sum = jnp.float32(0.0)

    if main > 0:
        rows = main // LANES
        # TR rounded to the packed-sublane multiple of the widest packing need.
        mult = max(_sublane_multiple(output.dtype), _sublane_multiple(label.dtype))
        tr = _MAX_TR if rows >= _MAX_TR else _round_up(rows, mult)
        row_chunk = _ROW_CHUNK if tr % _ROW_CHUNK == 0 else tr
        num_blocks = -(-rows // tr)

        x2 = x_flat[:main].reshape(rows, LANES)
        y2 = y_flat[:main].reshape(rows, LANES)

        bytes_in = main * (jnp.dtype(output.dtype).itemsize
                           + jnp.dtype(label.dtype).itemsize)
        cost = pl.CostEstimate(
            flops=6 * main,
            transcendentals=(1 if binary_labels else 2) * main,
            bytes_accessed=bytes_in + num_blocks * 8 * LANES * 4,
        )

        partials = pl.pallas_call(
            functools.partial(_bce_partial_kernel, tr=tr, row_chunk=row_chunk,
                              total_rows=rows, binary_labels=binary_labels),
            out_shape=jax.ShapeDtypeStruct((num_blocks, 8, LANES), jnp.float32),
            grid_spec=pltpu.PrefetchScalarGridSpec(
                num_scalar_prefetch=0,
                grid=(num_blocks,),
                in_specs=[
                    pl.BlockSpec((tr, LANES), lambda i: (i, 0)),
                    pl.BlockSpec((tr, LANES), lambda i: (i, 0)),
                ],
                out_specs=pl.BlockSpec((None, 8, LANES), lambda i: (i, 0, 0)),
            ),
            compiler_params=pltpu.CompilerParams(
                dimension_semantics=("parallel",),
                vmem_limit_bytes=_VMEM_LIMIT,
            ),
            cost_estimate=cost,
        )(x2, y2)

        pos_sum = pos_sum + jnp.sum(partials, dtype=jnp.float32)

    if rem > 0:
        # Tiny tail (< 128 elements): plain JAX, avoids any padding copy.
        pos_sum = pos_sum + jnp.sum(
            _bce_pos_elementwise(x_flat[main:], y_flat[main:]), dtype=jnp.float32)

    # Single negate + 1/N on the scalar (hoisted out of the kernel).
    return -pos_sum / jnp.float32(total)


if __name__ == "__main__":
    key = jax.random.PRNGKey(0)
    k1, k2, k3, k4 = jax.random.split(key, 4)

    # NCHW, 2048 elements total — probabilities in (0,1), hard {0,1} labels.
    B, C, H, W = 2, 4, 16, 16
    output = jax.nn.sigmoid(jax.random.normal(k1, (B, C, H, W), jnp.float32))
    label = (jax.random.uniform(k2, (B, C, H, W)) > 0.5).astype(jnp.float32)

    # General (soft-label, torch-parity) path.
    loss = contrastive_loss(output, label)
    jax.block_until_ready(loss)
    # Hard-label fast path (one log / element).
    loss_bin = contrastive_loss(output, label, binary_labels=True)
    jax.block_until_ready(loss_bin)

    ref = jnp.mean(-_bce_pos_elementwise(output, label))
    assert jnp.allclose(loss, ref, atol=2e-5, rtol=1e-5), (loss, ref)
    assert jnp.allclose(loss_bin, ref, atol=2e-5, rtol=1e-5), (loss_bin, ref)

    # Odd shape: exercises the masked last block + the <128-element JAX tail.
    output2 = jax.nn.sigmoid(jax.random.normal(k3, (3, 5, 7, 11), jnp.float32))
    label2 = jax.random.uniform(k4, (3, 5, 7, 11), jnp.float32)   # soft labels
    loss2 = contrastive_loss(output2, label2)
    jax.block_until_ready(loss2)
    ref2 = jnp.mean(-_bce_pos_elementwise(output2, label2))
    assert jnp.allclose(loss2, ref2, atol=2e-5, rtol=1e-5), (loss2, ref2)

    print("KERNEL_OK")
</pallas_src>

<mosaic_0001>
module attributes {stable_mosaic.version = 11 : i64} {
  func.func @_bce_partial_kernel(%arg0: i32, %arg1: memref<16x128xf32, #tpu.memory_space<vmem>>, %arg2: memref<16x128xf32, #tpu.memory_space<vmem>>, %arg3: memref<1x8x128xf32, #tpu.memory_space<vmem>>) attributes {dimension_semantics = [#tpu.dimension_semantics<parallel>], iteration_bounds = array<i64: 1>, scalar_prefetch = 0 : i64, scratch_operands = 0 : i64, tpu.core_type = #tpu.core_type<tc>, window_params = [{transform_indices = @transform_0, window_bounds = array<i64: 16, 128>}, {transform_indices = @transform_1, window_bounds = array<i64: 16, 128>}, {transform_indices = @transform_2, window_bounds = array<i64: 1, 8, 128>}]} {
    %cst = arith.constant 0.000000e+00 : f32
    %0 = vector.broadcast %cst : f32 to vector<8x128xf32>
    %c0_i32 = arith.constant 0 : i32
    %c16_i32 = arith.constant 16 : i32
    %1 = arith.muli %c0_i32, %c16_i32 : i32
    %2 = tpu.assume_multiple %1, 16 : i32
    %3 = arith.index_cast %2 : i32 to index
    %c0 = arith.constant 0 : index
    %4 = vector.load %arg1[%3, %c0] : memref<16x128xf32, #tpu.memory_space<vmem>>, vector<16x128xf32>
    %5 = arith.index_cast %2 : i32 to index
    %c0_0 = arith.constant 0 : index
    %6 = vector.load %arg2[%5, %c0_0] : memref<16x128xf32, #tpu.memory_space<vmem>>, vector<16x128xf32>
    %7 = math.log %4 : vector<16x128xf32>
    %cst_1 = arith.constant -1.000000e+02 : f32
    %8 = vector.broadcast %cst_1 : f32 to vector<16x128xf32>
    %9 = arith.maximumf %7, %8 : vector<16x128xf32>
    %cst_2 = arith.constant 1.000000e+00 : f32
    %10 = vector.broadcast %cst_2 : f32 to vector<16x128xf32>
    %11 = arith.subf %10, %4 : vector<16x128xf32>
    %12 = math.log %11 : vector<16x128xf32>
    %cst_3 = arith.constant -1.000000e+02 : f32
    %13 = vector.broadcast %cst_3 : f32 to vector<16x128xf32>
    %14 = arith.maximumf %12, %13 : vector<16x128xf32>
    %15 = arith.subf %9, %14 : vector<16x128xf32>
    %16 = arith.mulf %6, %15 : vector<16x128xf32>
    %17 = arith.addf %16, %14 : vector<16x128xf32>
    %18 = vector.shape_cast %17 : vector<16x128xf32> to vector<2x8x128xf32>
    %cst_4 = arith.constant dense<0.000000e+00> : vector<8x128xf32>
    %19 = vector.multi_reduction <add>, %18, %cst_4 [0] : vector<2x8x128xf32> to vector<8x128xf32>
    %20 = arith.addf %0, %19 : vector<8x128xf32>
    %c1_i32 = arith.constant 1 : i32
    %c0_5 = arith.constant 0 : index
    %c0_6 = arith.constant 0 : index
    %c0_7 = arith.constant 0 : index
    %21 = vector.load %arg3[%c0_5, %c0_6, %c0_7] : memref<1x8x128xf32, #tpu.memory_space<vmem>>, vector<1x8x128xf32>
    %22 = vector.shape_cast %21 : vector<1x8x128xf32> to vector<8x128xf32>
    %23 = vector.shape_cast %20 : vector<8x128xf32> to vector<1x8x128xf32>
    tpu.vector_store %arg3[%c0_5, %c0_6, %c0_7], %23 {strides = array<i32>} : memref<1x8x128xf32, #tpu.memory_space<vmem>>, vector<1x8x128xf32>,
    return
  }
  func.func @transform_0(%arg0: i32) -> (i32, i32) {
    %c0_i32 = arith.constant 0 : i32
    %c0_i32_0 = arith.constant 0 : i32
    return %arg0, %c0_i32 : i32, i32
  }
  func.func @transform_1(%arg0: i32) -> (i32, i32) {
    %c0_i32 = arith.constant 0 : i32
    %c0_i32_0 = arith.constant 0 : i32
    return %arg0, %c0_i32 : i32, i32
  }
  func.func @transform_2(%arg0: i32) -> (i32, i32, i32) {
    %c0_i32 = arith.constant 0 : i32
    %c0_i32_0 = arith.constant 0 : i32
    %c0_i32_1 = arith.constant 0 : i32
    return %arg0, %c0_i32, %c0_i32_0 : i32, i32, i32
  }
}

</mosaic_0001>

<bundles_post_ra>
// kernel: tpu_custom_call.1
= control target key start
LH: loop header
LB: loop body
LE: loop exit
PB: predicated region body
PF: predicated region fallthrough
CT: control target
= control target key end

     0   :  { %7 = vsyncpa [#allocation3], 0  ;;  %s224_s0 = inlined_call_operand.hbm [shape: f32[16,128], index: 0, kind: input, shape index: {}]   ;;  %s225_s1 = inlined_call_operand.hbm [shape: f32[16,128], index: 1, kind: input, shape index: {}]   ;;  %s226_s2 = inlined_call_operand.hbm [shape: f32[1,8,128], index: 2, kind: output, shape index: {}]  }
   0x1   :  { %8 = vsyncpa [#allocation6], 0 }
   0x2   :  { %9 = vsyncpa [#allocation4], 0  ;;  %s168_s9 = smov [#allocation2]   ;;  %s96_s13 = scalar_lea.hbm %s224_s0, 256 }
   0x3   :  { %s15_s10 = sshll.u32 %s168_s9, 4  ;;  %p97_p0 = scmp.ne.s32.totalorder %s224_s0, %s96_s13  ;;  %s16_s10 = int_to_ptr.vmem [resolvable:$true] %s15_s10 }
   0x4   :  { %p100_p1 = scmp.lt.u32.totalorder %s96_s13, %s224_s0 }
   0x6   :  { %p102_p2 = pnand %p100_p1, %p97_p0 }
   0x8   :  { %105 = shalt.err (!%p102_p2)
}
   0x9   :  { %s106_s18 = scalar_lea.vmem %s16_s10, 256  ;;  %p111_p4 = scmp.lt.s32.totalorder %s16_s10, %s16_s10 }
   0xa   :  { %p107_p3 = scmp.ne.s32.totalorder %s16_s10, %s106_s18  ;;  %p112_p5 = scmp.lt.s32.totalorder %s106_s18, %s106_s18 }
   0xc   :  { %p113_p6 = por %p112_p5, %p111_p4 }
   0xe   :  { %p114_p7 = pnand %p113_p6, %p107_p3 }
  0x10   :  { %117 = shalt.err (!%p114_p7)
}
  0x11   :  { %s169_s19 = smov 128   ;;  %s170_s20 = smov 8  }
  0x12   :  { %21 = dma.hbm_to_vmem [thread:$0]  %s224_s0, 256, %s16_s10, [#allocation3], %s169_s19, %s169_s19, %s170_s20  }
  0x13   :  { %s171_s23 = smov [#allocation5]   ;;  %s118_s27 = scalar_lea.hbm %s225_s1, 256 }
  0x14   :  { %s27_s24 = sshll.u32 %s171_s23, 4  ;;  %p119_p8 = scmp.ne.s32.totalorder %s225_s1, %s118_s27  ;;  %s28_s24 = int_to_ptr.vmem [resolvable:$true] %s27_s24 }
  0x15   :  { %p122_p9 = scmp.lt.u32.totalorder %s118_s27, %s225_s1 }
  0x17   :  { %p124_p10 = pnand %p122_p9, %p119_p8 }
  0x19   :  { %127 = shalt.err (!%p124_p10)
}
  0x1a   :  { %s128_s4 = scalar_lea.vmem %s28_s24, 256  ;;  %p133_p12 = scmp.lt.s32.totalorder %s28_s24, %s28_s24 }
  0x1b   :  { %p129_p11 = scmp.ne.s32.totalorder %s28_s24, %s128_s4  ;;  %p134_p13 = scmp.lt.s32.totalorder %s128_s4, %s128_s4 }
  0x1d   :  { %p135_p0 = por %p134_p13, %p133_p12 }
  0x1f   :  { %p136_p1 = pnand %p135_p0, %p129_p11 }
  0x21   :  { %139 = shalt.err (!%p136_p1)
}
  0x22   :  { %33 = dma.hbm_to_vmem [thread:$0]  %s225_s1, 256, %s28_s24, [#allocation6], %s169_s19, %s169_s19, %s170_s20  }
  0x23   :  { %162 = dma.done.wait [#allocation3], 256  }
  0x24   :  { %163 = vsyncadd [#allocation3], 4294967040 }
  0x25   :  { %164 = dma.done.wait [#allocation6], 256  }
  0x26   :  { %165 = vsyncadd [#allocation6], 4294967040  ;;  %v40_v0 = vld [vmem:[#allocation2] sm:$0xff]  ;;  %v41_v1 = vld [vmem:[#allocation2 + $0x8] sm:$0xff]  ;;  %s172_s1 = smov [#allocation7]  }
  0x27   :  { %88 = vlog2.f32 %v40_v0  ;;  %v50_v2 = vsub.f32 1.0, %v40_v0  ;;  %v51_v3 = vsub.f32 1.0, %v41_v1  ;;  %v42_v15 = vld [vmem:[#allocation5] sm:$0xff]  ;;  %v43_v17 = vld [vmem:[#allocation5 + $0x8] sm:$0xff]  ;;  %s73_s6 = sshll.u32 %s172_s1, 4  ;;  %s74_s6 = int_to_ptr.vmem [resolvable:$true] %s73_s6 }
  0x28   :  { %90 = vlog2.f32 %v41_v1  ;;  %s140_s7 = scalar_lea.vmem %s74_s6, 128  ;;  %p145_p3 = scmp.lt.s32.totalorder %s74_s6, %s74_s6 }
  0x29   :  { %92 = vlog2.f32 %v50_v2  ;;  %p141_p2 = scmp.ne.s32.totalorder %s74_s6, %s140_s7  ;;  %p146_p4 = scmp.lt.s32.totalorder %s140_s7, %s140_s7 }
  0x2a   :  { %94 = vlog2.f32 %v51_v3 }
  0x2b   :  { %p147_p5 = por %p146_p4, %p145_p3 }
  0x2d   :  { %p148_p6 = pnand %p147_p5, %p141_p2 }
  0x31   :  { %v89_v4 = vpop.eup %88 }
  0x32   :  { %v91_v5 = vpop.eup %90  ;;  %v45_v6 = vmul.f32 0.6931472, %v89_v4 }
  0x33   :  { %v93_v7 = vpop.eup %92  ;;  %v47_v8 = vmul.f32 0.6931472, %v91_v5 }
  0x34   :  { %v95_v9 = vpop.eup %94  ;;  %v48_v10 = vmax.f32 %v45_v6, -100.0  ;;  %v53_v11 = vmul.f32 0.6931472, %v93_v7 }
  0x35   :  { %v49_v12 = vmax.f32 %v47_v8, -100.0  ;;  %v55_v13 = vmul.f32 0.6931472, %v95_v9 }
  0x36   :  { %v56_v14 = vmax.f32 %v53_v11, -100.0 }
  0x37   :  { %v57_v16 = vmax.f32 %v55_v13, -100.0 }
  0x38   :  { %v58_v18 = vsub.f32 %v48_v10, %v56_v14 }
  0x39   :  { %v59_v19 = vsub.f32 %v49_v12, %v57_v16 }
  0x3a   :  { %v60_v20 = vmul.f32 %v58_v18, %v42_v15 }
  0x3b   :  { %v61_v21 = vmul.f32 %v59_v19, %v43_v17 }
  0x3c   :  { %v62_v22 = vadd.f32 %v60_v20, %v56_v14 }
  0x3d   :  { %v63_v23 = vadd.f32 %v61_v21, %v57_v16 }
  0x3f   :  { %v64_v24 = vadd.f32 %v63_v23, %v62_v22 }
  0x41   :  { %66 = vst [vmem:[#allocation7] sm:$0xff] %v64_v24 }
  0x42   :  { %151 = shalt.err (!%p148_p6)
}
  0x43   :  { %s152_s10 = scalar_lea.hbm %s226_s2, 128 }
  0x44   :  { %p153_p7 = scmp.ne.s32.totalorder %s226_s2, %s152_s10  ;;  %p156_p8 = scmp.lt.u32.totalorder %s152_s10, %s226_s2 }
  0x46   :  { %p158_p9 = pnand %p156_p8, %p153_p7 }
  0x48   :  { %161 = shalt.err (!%p158_p9)
}
  0x49   :  { %76 = dma.vmem_to_hbm [thread:$0]  %s74_s6, 128, %s226_s2, [#allocation4]  }
  0x4a   :  { %166 = dma.done.wait [#allocation4], 128  }
  0x4b   :  { %167 = vsyncadd [#allocation4], 4294967168 }
  0x4c   :  { %80 = vsyncpa [#allocation3], 1 }
  0x4d   :  { %81 = vsyncpa [#allocation6], 1 }
  0x4e   :  { %82 = vsyncpa [#allocation4], 1 }

</bundles_post_ra>
